<compile_context>
chip_gen: v7x
topology: tpu7x:2x2x1
jax: 0.10.0
libtpu: 0.0.40
codegen_flags: <defaults>
</compile_context>

<pallas_src>
import functools
import math

import jax
import jax.numpy as jnp
from jax.experimental import pallas as pl
from jax.experimental.pallas import tpu as pltpu

_SQRT_2_OVER_PI = math.sqrt(2.0 / math.pi)
_GELU_COEFF = 0.044715

# Keep the fully-fused path comfortably inside the default scoped VMEM limit
# on every generation (v5e default 16 MiB scoped).
_FUSED_VMEM_BUDGET_BYTES = 12 * 1024 * 1024


def _gelu_f32(z):
    # Factored tanh-approx GELU (algebraically identical to the reference,
    # one fewer VPU multiply).
    inner = _SQRT_2_OVER_PI * z * (1.0 + _GELU_COEFF * (z * z))
    return 0.5 * z * (1.0 + jnp.tanh(inner))


# -----------------------------------------------------------------------------
# Fused whole-network kernel (primary path).
# -----------------------------------------------------------------------------
def _make_fused_kernel(num_layers, use_skip):
    """use_skip is a static per-layer bool list (baked into the trace)."""

    def kernel(*refs):
        x_ref = refs[0]
        o_ref = refs[-1]
        wb_refs = refs[1:-1]  # (w0, b0, w1, b1, ...)

        h = x_ref[...].astype(jnp.float32)
        for i in range(num_layers):
            w = wb_refs[2 * i][...]
            b = wb_refs[2 * i + 1][...]
            z = jnp.dot(
                h.astype(jnp.bfloat16),
                w.astype(jnp.bfloat16),
                preferred_element_type=jnp.float32,
            )
            z = z + b.astype(jnp.float32)
            g = _gelu_f32(z)
            h = (h + g) if use_skip[i] else g
        o_ref[...] = h.astype(o_ref.dtype)

    return kernel


def _fused_fits_vmem(x, params):
    total = x.size * x.dtype.itemsize
    max_act = x.shape[0] * x.shape[1]
    for w, b in params:
        total += w.size * w.dtype.itemsize + b.size * b.dtype.itemsize
        max_act = max(max_act, x.shape[0] * w.shape[1])
    # output + a couple of live f32 activations worth of headroom
    total += 4 * max_act * 4
    return total <= _FUSED_VMEM_BUDGET_BYTES


def example_dnn_fused(x, params, skip_connection):
    M, D0 = x.shape
    use_skip = []
    cur = D0
    for w, b in params:
        assert w.shape[0] == cur, "layer input dim mismatch"
        assert b.shape == (w.shape[1],)
        use_skip.append(bool(skip_connection) and (w.shape[0] == w.shape[1]))
        cur = w.shape[1]
    out_dim = cur

    args = [x]
    for w, b in params:
        args.append(w)
        args.append(b.reshape(1, -1))  # 2-D bias for clean lane layout

    vmem_spec = pl.BlockSpec(memory_space=pltpu.MemorySpace.VMEM)
    kernel = _make_fused_kernel(len(params), use_skip)

    return pl.pallas_call(
        kernel,
        out_shape=jax.ShapeDtypeStruct((M, out_dim), x.dtype),
        in_specs=[vmem_spec] * len(args),
        out_specs=vmem_spec,
    )(*args)


# -----------------------------------------------------------------------------
# Tiled per-layer fallback (for shapes too large to keep fully VMEM-resident).
# -----------------------------------------------------------------------------
def _linear_gelu_kernel(x_ref, w_ref, b_ref, o_ref, acc_ref):
    k = pl.program_id(2)
    prod = jnp.dot(
        x_ref[...].astype(jnp.bfloat16),
        w_ref[...].astype(jnp.bfloat16),
        preferred_element_type=jnp.float32,
    )

    @pl.when(k == 0)
    def _():
        acc_ref[...] = prod

    @pl.when(k > 0)
    def _():
        acc_ref[...] += prod

    @pl.when(k == pl.num_programs(2) - 1)
    def _():
        z = acc_ref[...] + b_ref[...].astype(jnp.float32)
        o_ref[...] = _gelu_f32(z).astype(o_ref.dtype)


def _linear_gelu_residual_kernel(x_ref, w_ref, b_ref, r_ref, o_ref, acc_ref):
    k = pl.program_id(2)
    prod = jnp.dot(
        x_ref[...].astype(jnp.bfloat16),
        w_ref[...].astype(jnp.bfloat16),
        preferred_element_type=jnp.float32,
    )

    @pl.when(k == 0)
    def _():
        acc_ref[...] = prod

    @pl.when(k > 0)
    def _():
        acc_ref[...] += prod

    @pl.when(k == pl.num_programs(2) - 1)
    def _():
        z = acc_ref[...] + b_ref[...].astype(jnp.float32)
        y = _gelu_f32(z) + r_ref[...].astype(jnp.float32)
        o_ref[...] = y.astype(o_ref.dtype)


def linear_gelu(x, w, b, residual=None, *, tm=256, tn=512, tk=512):
    """GELU(x @ w + b) (+ residual).  w is (in, out)."""
    M, K = x.shape
    K2, N = w.shape
    assert K == K2
    tm = M if M <= tm else tm
    tn = N if N <= tn else tn
    tk = K if K <= tk else tk
    assert M % tm == 0 and N % tn == 0 and K % tk == 0, (
        "dims must tile cleanly; pad inputs for ragged shapes"
    )
    grid = (M // tm, N // tn, K // tk)
    b2 = b.reshape(1, N)

    in_specs = [
        pl.BlockSpec((tm, tk), lambda i, j, k: (i, k)),
        pl.BlockSpec((tk, tn), lambda i, j, k: (k, j)),
        pl.BlockSpec((1, tn), lambda i, j, k: (0, j)),
    ]
    args = [x, w, b2]
    kernel = _linear_gelu_kernel
    if residual is not None:
        assert residual.shape == (M, N)
        in_specs.append(pl.BlockSpec((tm, tn), lambda i, j, k: (i, j)))
        args.append(residual)
        kernel = _linear_gelu_residual_kernel

    return pl.pallas_call(
        kernel,
        out_shape=jax.ShapeDtypeStruct((M, N), x.dtype),
        grid=grid,
        in_specs=in_specs,
        out_specs=pl.BlockSpec((tm, tn), lambda i, j, k: (i, j)),
        scratch_shapes=[pltpu.VMEM((tm, tn), jnp.float32)],
        compiler_params=pltpu.CompilerParams(
            dimension_semantics=("parallel", "parallel", "arbitrary"),
        ),
    )(*args)


def example_dnn_pallas(x, params, skip_connection):
    """params: list of (w, b) with w as (in, out), in nn.ModuleList order."""
    if _fused_fits_vmem(x, params):
        return example_dnn_fused(x, params, skip_connection)
    # TODO(synk): large-shape path keeps weights in HBM and streams tiles
    # per layer; it does not fuse across layers.
    for w, b in params:
        use_skip = skip_connection and (w.shape[0] == w.shape[1])
        residual = x if use_skip else None
        x = linear_gelu(x, w, b, residual)
    return x


# --- pure-JAX f32 reference (matches the PyTorch module) ---------------------
def _gelu_ref(z):
    return 0.5 * z * (
        1.0 + jnp.tanh(_SQRT_2_OVER_PI * (z + _GELU_COEFF * z ** 3))
    )


def example_dnn_reference(x, params, skip_connection):
    for w, b in params:
        out = _gelu_ref(
            jnp.dot(x, w, preferred_element_type=jnp.float32) + b
        ).astype(x.dtype)
        if skip_connection and out.shape == x.shape:
            x = x + out
        else:
            x = out
    return x


if __name__ == "__main__":
    key = jax.random.PRNGKey(0)

    batch = 8
    # layer_sizes chosen so the PyTorch ModuleList ordering chains correctly
    # (s1 == s2 == s3); last layer widens so both residual and non-residual
    # layer variants are exercised.
    layer_sizes = [128, 128, 128, 128, 128, 256]
    skip_connection = True

    # nn.ModuleList construction order, applied in list order by forward():
    #   layers[0]: s0->s1, layers[1]: s2->s3, layers[2]: s1->s2,
    #   layers[3]: s3->s4, layers[4]: s4->s5
    pairs = [
        (layer_sizes[0], layer_sizes[1]),
        (layer_sizes[2], layer_sizes[3]),
        (layer_sizes[1], layer_sizes[2]),
        (layer_sizes[3], layer_sizes[4]),
        (layer_sizes[4], layer_sizes[5]),
    ]

    keys = jax.random.split(key, 2 * len(pairs) + 1)
    x = jax.random.normal(keys[0], (batch, layer_sizes[0]), dtype=jnp.float32)

    params = []
    for idx, (fan_in, fan_out) in enumerate(pairs):
        bound = 1.0 / math.sqrt(fan_in)  # PyTorch nn.Linear default init range
        w = jax.random.uniform(
            keys[1 + 2 * idx], (fan_in, fan_out),
            minval=-bound, maxval=bound, dtype=jnp.float32,
        )
        b = jax.random.uniform(
            keys[2 + 2 * idx], (fan_out,),
            minval=-bound, maxval=bound, dtype=jnp.float32,
        )
        params.append((w, b))

    y = example_dnn_pallas(x, params, skip_connection)
    jax.block_until_ready(y)

    y_ref = example_dnn_reference(x, params, skip_connection)
    assert y.shape == y_ref.shape and y.dtype == y_ref.dtype
    max_err = float(jnp.max(jnp.abs(y - y_ref)))
    # bf16 MXU operands vs f32 reference: tolerance covers the deliberate
    # precision change.
    assert jnp.allclose(y, y_ref, atol=3e-2, rtol=3e-2), (
        f"mismatch vs reference, max abs err {max_err}"
    )

    print("KERNEL_OK")
</pallas_src>

<mosaic_0001>
module attributes {stable_mosaic.version = 11 : i64} {
  func.func @kernel(%arg0: memref<8x128xf32, #tpu.memory_space<vmem>>, %arg1: memref<128x128xf32, #tpu.memory_space<vmem>>, %arg2: memref<1x128xf32, #tpu.memory_space<vmem>>, %arg3: memref<128x128xf32, #tpu.memory_space<vmem>>, %arg4: memref<1x128xf32, #tpu.memory_space<vmem>>, %arg5: memref<128x128xf32, #tpu.memory_space<vmem>>, %arg6: memref<1x128xf32, #tpu.memory_space<vmem>>, %arg7: memref<128x128xf32, #tpu.memory_space<vmem>>, %arg8: memref<1x128xf32, #tpu.memory_space<vmem>>, %arg9: memref<128x256xf32, #tpu.memory_space<vmem>>, %arg10: memref<1x256xf32, #tpu.memory_space<vmem>>, %arg11: memref<8x256xf32, #tpu.memory_space<vmem>>) attributes {dimension_semantics = [], scalar_prefetch = 0 : i64, scratch_operands = 0 : i64, tpu.core_type = #tpu.core_type<tc>} {
    %c0 = arith.constant 0 : index
    %c0_0 = arith.constant 0 : index
    %0 = vector.load %arg0[%c0, %c0_0] : memref<8x128xf32, #tpu.memory_space<vmem>>, vector<8x128xf32>
    %c0_1 = arith.constant 0 : index
    %c0_2 = arith.constant 0 : index
    %1 = vector.load %arg1[%c0_1, %c0_2] : memref<128x128xf32, #tpu.memory_space<vmem>>, vector<128x128xf32>
    %c0_3 = arith.constant 0 : index
    %c0_4 = arith.constant 0 : index
    %2 = vector.load %arg2[%c0_3, %c0_4] : memref<1x128xf32, #tpu.memory_space<vmem>>, vector<1x128xf32>
    %3 = arith.truncf %0 : vector<8x128xf32> to vector<8x128xbf16>
    %4 = arith.truncf %1 : vector<128x128xf32> to vector<128x128xbf16>
    %cst = arith.constant dense<0.000000e+00> : vector<8x128xf32>
    %5 = tpu.matmul %3, %4, %cst {dimension_numbers = #tpu.dot_dimension_numbers<[1], [0], [0], [1], [0, 0, 1, 1], [], []>} : vector<8x128xbf16>, vector<128x128xbf16>, vector<8x128xf32> -> vector<8x128xf32>
    %6 = vector.broadcast %2 : vector<1x128xf32> to vector<8x128xf32>
    %7 = arith.addf %5, %6 : vector<8x128xf32>
    %cst_5 = arith.constant 0.797884583 : f32
    %8 = vector.broadcast %cst_5 : f32 to vector<8x128xf32>
    %9 = arith.mulf %8, %7 : vector<8x128xf32>
    %10 = arith.mulf %7, %7 : vector<8x128xf32>
    %cst_6 = arith.constant 4.471500e-02 : f32
    %11 = vector.broadcast %cst_6 : f32 to vector<8x128xf32>
    %12 = arith.mulf %11, %10 : vector<8x128xf32>
    %cst_7 = arith.constant 1.000000e+00 : f32
    %13 = vector.broadcast %cst_7 : f32 to vector<8x128xf32>
    %14 = arith.addf %13, %12 : vector<8x128xf32>
    %15 = arith.mulf %9, %14 : vector<8x128xf32>
    %cst_8 = arith.constant 5.000000e-01 : f32
    %16 = vector.broadcast %cst_8 : f32 to vector<8x128xf32>
    %17 = arith.mulf %16, %7 : vector<8x128xf32>
    %18 = math.tanh %15 : vector<8x128xf32>
    %cst_9 = arith.constant 1.000000e+00 : f32
    %19 = vector.broadcast %cst_9 : f32 to vector<8x128xf32>
    %20 = arith.addf %19, %18 : vector<8x128xf32>
    %21 = arith.mulf %17, %20 : vector<8x128xf32>
    %22 = arith.addf %0, %21 : vector<8x128xf32>
    %c0_10 = arith.constant 0 : index
    %c0_11 = arith.constant 0 : index
    %23 = vector.load %arg3[%c0_10, %c0_11] : memref<128x128xf32, #tpu.memory_space<vmem>>, vector<128x128xf32>
    %c0_12 = arith.constant 0 : index
    %c0_13 = arith.constant 0 : index
    %24 = vector.load %arg4[%c0_12, %c0_13] : memref<1x128xf32, #tpu.memory_space<vmem>>, vector<1x128xf32>
    %25 = arith.truncf %22 : vector<8x128xf32> to vector<8x128xbf16>
    %26 = arith.truncf %23 : vector<128x128xf32> to vector<128x128xbf16>
    %cst_14 = arith.constant dense<0.000000e+00> : vector<8x128xf32>
    %27 = tpu.matmul %25, %26, %cst_14 {dimension_numbers = #tpu.dot_dimension_numbers<[1], [0], [0], [1], [0, 0, 1, 1], [], []>} : vector<8x128xbf16>, vector<128x128xbf16>, vector<8x128xf32> -> vector<8x128xf32>
    %28 = vector.broadcast %24 : vector<1x128xf32> to vector<8x128xf32>
    %29 = arith.addf %27, %28 : vector<8x128xf32>
    %cst_15 = arith.constant 0.797884583 : f32
    %30 = vector.broadcast %cst_15 : f32 to vector<8x128xf32>
    %31 = arith.mulf %30, %29 : vector<8x128xf32>
    %32 = arith.mulf %29, %29 : vector<8x128xf32>
    %cst_16 = arith.constant 4.471500e-02 : f32
    %33 = vector.broadcast %cst_16 : f32 to vector<8x128xf32>
    %34 = arith.mulf %33, %32 : vector<8x128xf32>
    %cst_17 = arith.constant 1.000000e+00 : f32
    %35 = vector.broadcast %cst_17 : f32 to vector<8x128xf32>
    %36 = arith.addf %35, %34 : vector<8x128xf32>
    %37 = arith.mulf %31, %36 : vector<8x128xf32>
    %cst_18 = arith.constant 5.000000e-01 : f32
    %38 = vector.broadcast %cst_18 : f32 to vector<8x128xf32>
    %39 = arith.mulf %38, %29 : vector<8x128xf32>
    %40 = math.tanh %37 : vector<8x128xf32>
    %cst_19 = arith.constant 1.000000e+00 : f32
    %41 = vector.broadcast %cst_19 : f32 to vector<8x128xf32>
    %42 = arith.addf %41, %40 : vector<8x128xf32>
    %43 = arith.mulf %39, %42 : vector<8x128xf32>
    %44 = arith.addf %22, %43 : vector<8x128xf32>
    %c0_20 = arith.constant 0 : index
    %c0_21 = arith.constant 0 : index
    %45 = vector.load %arg5[%c0_20, %c0_21] : memref<128x128xf32, #tpu.memory_space<vmem>>, vector<128x128xf32>
    %c0_22 = arith.constant 0 : index
    %c0_23 = arith.constant 0 : index
    %46 = vector.load %arg6[%c0_22, %c0_23] : memref<1x128xf32, #tpu.memory_space<vmem>>, vector<1x128xf32>
    %47 = arith.truncf %44 : vector<8x128xf32> to vector<8x128xbf16>
    %48 = arith.truncf %45 : vector<128x128xf32> to vector<128x128xbf16>
    %cst_24 = arith.constant dense<0.000000e+00> : vector<8x128xf32>
    %49 = tpu.matmul %47, %48, %cst_24 {dimension_numbers = #tpu.dot_dimension_numbers<[1], [0], [0], [1], [0, 0, 1, 1], [], []>} : vector<8x128xbf16>, vector<128x128xbf16>, vector<8x128xf32> -> vector<8x128xf32>
    %50 = vector.broadcast %46 : vector<1x128xf32> to vector<8x128xf32>
    %51 = arith.addf %49, %50 : vector<8x128xf32>
    %cst_25 = arith.constant 0.797884583 : f32
    %52 = vector.broadcast %cst_25 : f32 to vector<8x128xf32>
    %53 = arith.mulf %52, %51 : vector<8x128xf32>
    %54 = arith.mulf %51, %51 : vector<8x128xf32>
    %cst_26 = arith.constant 4.471500e-02 : f32
    %55 = vector.broadcast %cst_26 : f32 to vector<8x128xf32>
    %56 = arith.mulf %55, %54 : vector<8x128xf32>
    %cst_27 = arith.constant 1.000000e+00 : f32
    %57 = vector.broadcast %cst_27 : f32 to vector<8x128xf32>
    %58 = arith.addf %57, %56 : vector<8x128xf32>
    %59 = arith.mulf %53, %58 : vector<8x128xf32>
    %cst_28 = arith.constant 5.000000e-01 : f32
    %60 = vector.broadcast %cst_28 : f32 to vector<8x128xf32>
    %61 = arith.mulf %60, %51 : vector<8x128xf32>
    %62 = math.tanh %59 : vector<8x128xf32>
    %cst_29 = arith.constant 1.000000e+00 : f32
    %63 = vector.broadcast %cst_29 : f32 to vector<8x128xf32>
    %64 = arith.addf %63, %62 : vector<8x128xf32>
    %65 = arith.mulf %61, %64 : vector<8x128xf32>
    %66 = arith.addf %44, %65 : vector<8x128xf32>
    %c0_30 = arith.constant 0 : index
    %c0_31 = arith.constant 0 : index
    %67 = vector.load %arg7[%c0_30, %c0_31] : memref<128x128xf32, #tpu.memory_space<vmem>>, vector<128x128xf32>
    %c0_32 = arith.constant 0 : index
    %c0_33 = arith.constant 0 : index
    %68 = vector.load %arg8[%c0_32, %c0_33] : memref<1x128xf32, #tpu.memory_space<vmem>>, vector<1x128xf32>
    %69 = arith.truncf %66 : vector<8x128xf32> to vector<8x128xbf16>
    %70 = arith.truncf %67 : vector<128x128xf32> to vector<128x128xbf16>
    %cst_34 = arith.constant dense<0.000000e+00> : vector<8x128xf32>
    %71 = tpu.matmul %69, %70, %cst_34 {dimension_numbers = #tpu.dot_dimension_numbers<[1], [0], [0], [1], [0, 0, 1, 1], [], []>} : vector<8x128xbf16>, vector<128x128xbf16>, vector<8x128xf32> -> vector<8x128xf32>
    %72 = vector.broadcast %68 : vector<1x128xf32> to vector<8x128xf32>
    %73 = arith.addf %71, %72 : vector<8x128xf32>
    %cst_35 = arith.constant 0.797884583 : f32
    %74 = vector.broadcast %cst_35 : f32 to vector<8x128xf32>
    %75 = arith.mulf %74, %73 : vector<8x128xf32>
    %76 = arith.mulf %73, %73 : vector<8x128xf32>
    %cst_36 = arith.constant 4.471500e-02 : f32
    %77 = vector.broadcast %cst_36 : f32 to vector<8x128xf32>
    %78 = arith.mulf %77, %76 : vector<8x128xf32>
    %cst_37 = arith.constant 1.000000e+00 : f32
    %79 = vector.broadcast %cst_37 : f32 to vector<8x128xf32>
    %80 = arith.addf %79, %78 : vector<8x128xf32>
    %81 = arith.mulf %75, %80 : vector<8x128xf32>
    %cst_38 = arith.constant 5.000000e-01 : f32
    %82 = vector.broadcast %cst_38 : f32 to vector<8x128xf32>
    %83 = arith.mulf %82, %73 : vector<8x128xf32>
    %84 = math.tanh %81 : vector<8x128xf32>
    %cst_39 = arith.constant 1.000000e+00 : f32
    %85 = vector.broadcast %cst_39 : f32 to vector<8x128xf32>
    %86 = arith.addf %85, %84 : vector<8x128xf32>
    %87 = arith.mulf %83, %86 : vector<8x128xf32>
    %88 = arith.addf %66, %87 : vector<8x128xf32>
    %c0_40 = arith.constant 0 : index
    %c0_41 = arith.constant 0 : index
    %89 = vector.load %arg9[%c0_40, %c0_41] : memref<128x256xf32, #tpu.memory_space<vmem>>, vector<128x256xf32>
    %c0_42 = arith.constant 0 : index
    %c0_43 = arith.constant 0 : index
    %90 = vector.load %arg10[%c0_42, %c0_43] : memref<1x256xf32, #tpu.memory_space<vmem>>, vector<1x256xf32>
    %91 = arith.truncf %88 : vector<8x128xf32> to vector<8x128xbf16>
    %92 = arith.truncf %89 : vector<128x256xf32> to vector<128x256xbf16>
    %cst_44 = arith.constant dense<0.000000e+00> : vector<8x256xf32>
    %93 = tpu.matmul %91, %92, %cst_44 {dimension_numbers = #tpu.dot_dimension_numbers<[1], [0], [0], [1], [0, 0, 1, 1], [], []>} : vector<8x128xbf16>, vector<128x256xbf16>, vector<8x256xf32> -> vector<8x256xf32>
    %94 = vector.broadcast %90 : vector<1x256xf32> to vector<8x256xf32>
    %95 = arith.addf %93, %94 : vector<8x256xf32>
    %cst_45 = arith.constant 0.797884583 : f32
    %96 = vector.broadcast %cst_45 : f32 to vector<8x256xf32>
    %97 = arith.mulf %96, %95 : vector<8x256xf32>
    %98 = arith.mulf %95, %95 : vector<8x256xf32>
    %cst_46 = arith.constant 4.471500e-02 : f32
    %99 = vector.broadcast %cst_46 : f32 to vector<8x256xf32>
    %100 = arith.mulf %99, %98 : vector<8x256xf32>
    %cst_47 = arith.constant 1.000000e+00 : f32
    %101 = vector.broadcast %cst_47 : f32 to vector<8x256xf32>
    %102 = arith.addf %101, %100 : vector<8x256xf32>
    %103 = arith.mulf %97, %102 : vector<8x256xf32>
    %cst_48 = arith.constant 5.000000e-01 : f32
    %104 = vector.broadcast %cst_48 : f32 to vector<8x256xf32>
    %105 = arith.mulf %104, %95 : vector<8x256xf32>
    %106 = math.tanh %103 : vector<8x256xf32>
    %cst_49 = arith.constant 1.000000e+00 : f32
    %107 = vector.broadcast %cst_49 : f32 to vector<8x256xf32>
    %108 = arith.addf %107, %106 : vector<8x256xf32>
    %109 = arith.mulf %105, %108 : vector<8x256xf32>
    %c0_50 = arith.constant 0 : index
    %c0_51 = arith.constant 0 : index
    %110 = vector.load %arg11[%c0_50, %c0_51] : memref<8x256xf32, #tpu.memory_space<vmem>>, vector<8x256xf32>
    tpu.vector_store %arg11[%c0_50, %c0_51], %109 {strides = array<i32>} : memref<8x256xf32, #tpu.memory_space<vmem>>, vector<8x256xf32>,
    return
  }
}

</mosaic_0001>

<bundles_post_ra>
// kernel: tpu_custom_call.1
= control target key start
LH: loop header
LB: loop body
LE: loop exit
PB: predicated region body
PF: predicated region fallthrough
CT: control target
= control target key end

     0   :  { %16 = vsyncpa [#allocation3], 0  ;;  %s1134_s0 = inlined_call_operand.hbm [shape: f32[8,128], index: 0, kind: input, shape index: {}]   ;;  %s1135_s1 = inlined_call_operand.hbm [shape: f32[128,128], index: 1, kind: input, shape index: {}]   ;;  %s1136_s2 = inlined_call_operand.vmem [shape: f32[1,128], index: 2, kind: input, shape index: {}]   ;;  %s1137_s3 = inlined_call_operand.hbm [shape: f32[128,128], index: 3, kind: input, shape index: {}]   ;;  %s1138_s4 = inlined_call_operand.vmem [shape: f32[1,128], index: 4, kind: input, shape index: {}]   ;;  %s1139_s5 = inlined_call_operand.hbm [shape: f32[128,128], index: 5, kind: input, shape index: {}]   ;;  %s1140_s6 = inlined_call_operand.vmem [shape: f32[1,128], index: 6, kind: input, shape index: {}]   ;;  %s1141_s7 = inlined_call_operand.hbm [shape: f32[128,128], index: 7, kind: input, shape index: {}]   ;;  %s1142_s8 = inlined_call_operand.vmem [shape: f32[1,128], index: 8, kind: input, shape index: {}]   ;;  %s1143_s9 = inlined_call_operand.hbm [shape: f32[128,256], index: 9, kind: input, shape index: {}]   ;;  %s1144_s10 = inlined_call_operand.vmem [shape: f32[1,256], index: 10, kind: input, shape index: {}]   ;;  %s1145_s11 = inlined_call_operand.hbm [shape: f32[8,256], index: 11, kind: output, shape index: {}]  }
   0x1   :  { %17 = vsyncpa [#allocation6], 0 }
   0x2   :  { %18 = vsyncpa [#allocation9], 0 }
   0x3   :  { %19 = vsyncpa [#allocation12], 0 }
   0x4   :  { %20 = vsyncpa [#allocation4], 0  ;;  %s899_s17 = smov [#allocation5]   ;;  %s735_s21 = scalar_lea.hbm %s1135_s1, 2048 }
   0x5   :  { %s36_s18 = sshll.u32 %s899_s17, 4  ;;  %p736_p0 = scmp.ne.s32.totalorder %s1135_s1, %s735_s21  ;;  %s37_s18 = int_to_ptr.vmem [resolvable:$true] %s36_s18 }
   0x6   :  { %p739_p1 = scmp.lt.u32.totalorder %s735_s21, %s1135_s1 }
   0x8   :  { %p741_p2 = pnand %p739_p1, %p736_p0 }
   0xa   :  { %744 = shalt.err (!%p741_p2)
}
   0xb   :  { %s745_s26 = scalar_lea.vmem %s37_s18, 2048  ;;  %p750_p4 = scmp.lt.s32.totalorder %s37_s18, %s37_s18 }
   0xc   :  { %p746_p3 = scmp.ne.s32.totalorder %s37_s18, %s745_s26  ;;  %p751_p5 = scmp.lt.s32.totalorder %s745_s26, %s745_s26 }
   0xe   :  { %p752_p6 = por %p751_p5, %p750_p4 }
  0x10   :  { %p753_p7 = pnand %p752_p6, %p746_p3 }
  0x12   :  { %756 = shalt.err (!%p753_p7)
}
  0x13   :  { %s900_s27 = smov 128   ;;  %s901_s28 = smov 8  }
  0x14   :  { %42 = dma.hbm_to_vmem [thread:$0]  %s1135_s1, 2048, %s37_s18, [#allocation6], %s900_s27, %s900_s27, %s901_s28  }
  0x15   :  { %s902_s12 = smov [#allocation8]   ;;  %s903_s14 = smov [#allocation2]  }
  0x16   :  { %s64_s13 = sshll.u32 %s902_s12, 4  ;;  %s27_s15 = sshll.u32 %s903_s14, 4  ;;  %s65_s13 = int_to_ptr.vmem [resolvable:$true] %s64_s13  ;;  %s28_s15 = int_to_ptr.vmem [resolvable:$true] %s27_s15 }
  0x17   :  { %s757_s19 = scalar_lea.hbm %s1139_s5, 2048 }
  0x18   :  { %p758_p8 = scmp.ne.s32.totalorder %s1139_s5, %s757_s19  ;;  %p761_p9 = scmp.lt.u32.totalorder %s757_s19, %s1139_s5 }
  0x1a   :  { %p763_p10 = pnand %p761_p9, %p758_p8 }
  0x1c   :  { %766 = shalt.err (!%p763_p10)
}
  0x1d   :  { %s767_s1 = scalar_lea.vmem %s65_s13, 2048  ;;  %p772_p12 = scmp.lt.s32.totalorder %s65_s13, %s65_s13 }
  0x1e   :  { %p768_p11 = scmp.ne.s32.totalorder %s65_s13, %s767_s1  ;;  %p773_p13 = scmp.lt.s32.totalorder %s767_s1, %s767_s1 }
  0x20   :  { %p774_p0 = por %p773_p13, %p772_p12 }
  0x22   :  { %p775_p1 = pnand %p774_p0, %p768_p11 }
  0x24   :  { %778 = shalt.err (!%p775_p1)
}
  0x25   :  { %70 = dma.hbm_to_vmem [thread:$0]  %s1139_s5, 2048, %s65_s13, [#allocation9], %s900_s27, %s900_s27, %s901_s28  }
  0x26   :  { %s779_s29 = scalar_lea.hbm %s1134_s0, 128 }
  0x27   :  { %p780_p2 = scmp.ne.s32.totalorder %s1134_s0, %s779_s29  ;;  %p783_p3 = scmp.lt.u32.totalorder %s779_s29, %s1134_s0 }
  0x29   :  { %p785_p4 = pnand %p783_p3, %p780_p2 }
  0x2b   :  { %788 = shalt.err (!%p785_p4)
}
  0x2c   :  { %s789_s17 = scalar_lea.vmem %s28_s15, 128  ;;  %p794_p6 = scmp.lt.s32.totalorder %s28_s15, %s28_s15 }
  0x2d   :  { %p790_p5 = scmp.ne.s32.totalorder %s28_s15, %s789_s17  ;;  %p795_p7 = scmp.lt.s32.totalorder %s789_s17, %s789_s17 }
  0x2f   :  { %p796_p8 = por %p795_p7, %p794_p6 }
  0x31   :  { %p797_p9 = pnand %p796_p8, %p790_p5 }
  0x33   :  { %800 = shalt.err (!%p797_p9)
}
  0x34   :  { %30 = dma.hbm_to_vmem [thread:$0]  %s1134_s0, 128, %s28_s15, [#allocation3]  }
  0x35   :  { %s904_s19 = smov [#allocation7]   ;;  %s905_s21 = smov [#allocation10]  }
  0x36   :  { %s50_s20 = sshll.u32 %s904_s19, 4  ;;  %s78_s22 = sshll.u32 %s905_s21, 4  ;;  %s51_s20 = int_to_ptr.vmem [resolvable:$true] %s50_s20  ;;  %s79_s22 = int_to_ptr.vmem [resolvable:$true] %s78_s22 }
  0x37   :  { %s801_s18 = scalar_lea.hbm %s1137_s3, 2048 }
  0x38   :  { %p802_p10 = scmp.ne.s32.totalorder %s1137_s3, %s801_s18  ;;  %p805_p11 = scmp.lt.u32.totalorder %s801_s18, %s1137_s3 }
  0x3a   :  { %p807_p12 = pnand %p805_p11, %p802_p10 }
  0x3c   :  { %810 = shalt.err (!%p807_p12)
}
  0x3d   :  { %s811_s0 = scalar_lea.vmem %s51_s20, 2048  ;;  %p816_p0 = scmp.lt.s32.totalorder %s51_s20, %s51_s20 }
  0x3e   :  { %p812_p13 = scmp.ne.s32.totalorder %s51_s20, %s811_s0  ;;  %p817_p1 = scmp.lt.s32.totalorder %s811_s0, %s811_s0 }
  0x40   :  { %p818_p2 = por %p817_p1, %p816_p0 }
  0x42   :  { %p819_p3 = pnand %p818_p2, %p812_p13 }
  0x44   :  { %822 = shalt.err (!%p819_p3)
}
  0x45   :  { %56 = dma.hbm_to_vmem [thread:$0]  %s1137_s3, 2048, %s51_s20, [#allocation6], %s900_s27, %s900_s27, %s901_s28  }
  0x46   :  { %s823_s16 = scalar_lea.hbm %s1141_s7, 2048 }
  0x47   :  { %p824_p4 = scmp.ne.s32.totalorder %s1141_s7, %s823_s16  ;;  %p827_p5 = scmp.lt.u32.totalorder %s823_s16, %s1141_s7 }
  0x49   :  { %p829_p6 = pnand %p827_p5, %p824_p4 }
  0x4b   :  { %832 = shalt.err (!%p829_p6)
}
  0x4c   :  { %s833_s21 = scalar_lea.vmem %s79_s22, 2048  ;;  %p838_p8 = scmp.lt.s32.totalorder %s79_s22, %s79_s22 }
  0x4d   :  { %p834_p7 = scmp.ne.s32.totalorder %s79_s22, %s833_s21  ;;  %p839_p9 = scmp.lt.s32.totalorder %s833_s21, %s833_s21 }
  0x4f   :  { %p840_p10 = por %p839_p9, %p838_p8 }
  0x51   :  { %p841_p11 = pnand %p840_p10, %p834_p7 }
  0x53   :  { %844 = shalt.err (!%p841_p11)
}
  0x54   :  { %84 = dma.hbm_to_vmem [thread:$0]  %s1141_s7, 2048, %s79_s22, [#allocation9], %s900_s27, %s900_s27, %s901_s28  }
  0x55   :  { %s906_s23 = smov [#allocation11]   ;;  %s845_s25 = scalar_lea.hbm %s1143_s9, 4096 }
  0x56   :  { %s92_s1 = sshll.u32 %s906_s23, 4  ;;  %p846_p12 = scmp.ne.s32.totalorder %s1143_s9, %s845_s25  ;;  %s93_s1 = int_to_ptr.vmem [resolvable:$true] %s92_s1 }
  0x57   :  { %p849_p13 = scmp.lt.u32.totalorder %s845_s25, %s1143_s9 }
  0x59   :  { %p851_p0 = pnand %p849_p13, %p846_p12 }
  0x5b   :  { %854 = shalt.err (!%p851_p0)
}
  0x5c   :  { %s855_s30 = scalar_lea.vmem %s93_s1, 4096  ;;  %p860_p2 = scmp.lt.s32.totalorder %s93_s1, %s93_s1 }
  0x5d   :  { %p856_p1 = scmp.ne.s32.totalorder %s93_s1, %s855_s30  ;;  %p861_p3 = scmp.lt.s32.totalorder %s855_s30, %s855_s30 }
  0x5f   :  { %p862_p4 = por %p861_p3, %p860_p2 }
  0x61   :  { %p863_p5 = pnand %p862_p4, %p856_p1 }
  0x63   :  { %866 = shalt.err (!%p863_p5)
}
  0x64   :  { %s907_s7 = smov 256   ;;  %s908_s27 = smov 16  }
  0x65   :  { %98 = dma.hbm_to_vmem [thread:$0]  %s1143_s9, 4096, %s93_s1, [#allocation12], %s907_s7, %s907_s7, %s908_s27  }
  0x66   :  { %889 = dma.done.wait [#allocation3], 128  }
  0x67   :  { %890 = vsyncadd [#allocation3], 4294967168 }
  0x68   :  { %891 = dma.done.wait [#allocation6], 4096  }
  0x69   :  { %892 = vsyncadd [#allocation6], 4294963200 }
  0x6a   :  { %893 = dma.done.wait [#allocation9], 4096  }
  0x6b   :  { %894 = vsyncadd [#allocation9], 4294963200 }
  0x6c   :  { %895 = dma.done.wait [#allocation12], 4096  }
  0x6d   :  { %896 = vsyncadd [#allocation12], 4294963200  ;;  %v909_v0 = vmov 0.0   ;;  %vm910_vm0 = vmmov 0   ;;  %v121_v1 = vld [vmem:[#allocation5] sm:$0xff]  ;;  %v122_v2 = vld [vmem:[#allocation5 + $0x8] sm:$0xff] }
  0x6e   :  { %629 = vmatprep.subr.bf16.mxu0 %v909_v0  ;;  %645 = vmatprep.mubr.msk.bf16.mxu0 %vm910_vm0, %v909_v0  ;;  %v123_v3 = vld [vmem:[#allocation5 + $0x10] sm:$0xff]  ;;  %v139_v4 = vpack.c.bf16 %v122_v2, %v121_v1  ;;  %v124_v5 = vld [vmem:[#allocation5 + $0x18] sm:$0xff]  ;;  %v125_v7 = vld [vmem:[#allocation5 + $0x20] sm:$0xff] }
  0x6f   :  { %649 = vmatprep.subr.bf16.mxu1 %v909_v0  ;;  %665 = vmatprep.mubr.msk.bf16.mxu1 %vm910_vm0, %v909_v0  ;;  %v140_v6 = vpack.c.bf16 %v124_v5, %v123_v3  ;;  %v126_v8 = vld [vmem:[#allocation5 + $0x28] sm:$0xff]  ;;  %v203_v9 = vld [vmem:[#allocation7] sm:$0xff]  ;;  %v127_v13 = vld [vmem:[#allocation5 + $0x30] sm:$0xff] }
  0x70   :  { %630 = vmatpush3.bf16.msra.mxu0 %v139_v4  ;;  %v204_v10 = vld [vmem:[#allocation7 + $0x8] sm:$0xff]  ;;  %v141_v11 = vpack.c.bf16 %v126_v8, %v125_v7  ;;  %v128_v14 = vld [vmem:[#allocation5 + $0x38] sm:$0xff]  ;;  %v129_v16 = vld [vmem:[#allocation5 + $0x40] sm:$0xff] }
  0x71   :  { %631 = vmatprep.subr.bf16.mxu0 %v909_v0  ;;  %v221_v12 = vpack.c.bf16 %v204_v10, %v203_v9  ;;  %v142_v15 = vpack.c.bf16 %v128_v14, %v127_v13  ;;  %v130_v17 = vld [vmem:[#allocation5 + $0x48] sm:$0xff]  ;;  %v131_v19 = vld [vmem:[#allocation5 + $0x50] sm:$0xff]  ;;  %v132_v20 = vld [vmem:[#allocation5 + $0x58] sm:$0xff] }
  0x72   :  { %v143_v18 = vpack.c.bf16 %v130_v17, %v129_v16  ;;  %v144_v21 = vpack.c.bf16 %v132_v20, %v131_v19  ;;  %v133_v22 = vld [vmem:[#allocation5 + $0x60] sm:$0xff]  ;;  %v134_v23 = vld [vmem:[#allocation5 + $0x68] sm:$0xff]  ;;  %v135_v25 = vld [vmem:[#allocation5 + $0x70] sm:$0xff] }
  0x73   :  { %650 = vmatpush3.bf16.msra.mxu1 %v221_v12  ;;  %v145_v24 = vpack.c.bf16 %v134_v23, %v133_v22  ;;  %v136_v26 = vld [vmem:[#allocation5 + $0x78] sm:$0xff]  ;;  %v205_v30 = vld [vmem:[#allocation7 + $0x10] sm:$0xff]  ;;  %v207_v33 = vld [vmem:[#allocation7 + $0x20] sm:$0xff] }
  0x74   :  { %632 = vmatpush3.bf16.msra.mxu0 %v140_v6  ;;  %651 = vmatprep.subr.bf16.mxu1 %v909_v0  ;;  %v146_v27 = vpack.c.bf16 %v136_v26, %v135_v25  ;;  %v1070_v28 = vld [vmem:[#allocation2] sm:$0xff]  ;;  %v208_v34 = vld [vmem:[#allocation7 + $0x28] sm:$0xff]  ;;  %v209_v36 = vld [vmem:[#allocation7 + $0x30] sm:$0xff] }
  0x75   :  { %633 = vmatprep.subr.bf16.mxu0 %v909_v0  ;;  %v138_v29 = vpack.c.bf16 %v1070_v28, %v1070_v28  ;;  %v206_v31 = vld [vmem:[#allocation7 + $0x18] sm:$0xff]  ;;  %v223_v35 = vpack.c.bf16 %v208_v34, %v207_v33  ;;  %v211_v39 = vld [vmem:[#allocation7 + $0x40] sm:$0xff]  ;;  %v212_v40 = vld [vmem:[#allocation7 + $0x48] sm:$0xff] }
  0x76   :  { %v222_v32 = vpack.c.bf16 %v206_v31, %v205_v30  ;;  %v210_v37 = vld [vmem:[#allocation7 + $0x38] sm:$0xff]  ;;  %v225_v41 = vpack.c.bf16 %v212_v40, %v211_v39  ;;  %v213_v42 = vld [vmem:[#allocation7 + $0x50] sm:$0xff]  ;;  %v215_v45 = vld [vmem:[#allocation7 + $0x60] sm:$0xff] }
  0x77   :  { %v224_v38 = vpack.c.bf16 %v210_v37, %v209_v36  ;;  %v214_v43 = vld [vmem:[#allocation7 + $0x58] sm:$0xff]  ;;  %v216_v46 = vld [vmem:[#allocation7 + $0x68] sm:$0xff]  ;;  %v217_v48 = vld [vmem:[#allocation7 + $0x70] sm:$0xff] }
  0x78   :  { %634 = vmatpush3.bf16.msra.mxu0 %v141_v11  ;;  %652 = vmatpush3.bf16.msra.mxu1 %v222_v32  ;;  %v226_v44 = vpack.c.bf16 %v214_v43, %v213_v42  ;;  %v227_v47 = vpack.c.bf16 %v216_v46, %v215_v45  ;;  %v218_v49 = vld [vmem:[#allocation7 + $0x78] sm:$0xff]  ;;  %v285_v51 = vld [vmem:[#allocation8] sm:$0xff]  ;;  %v286_v52 = vld [vmem:[#allocation8 + $0x8] sm:$0xff] }
  0x79   :  { %635 = vmatprep.subr.bf16.mxu0 %v909_v0  ;;  %653 = vmatprep.subr.bf16.mxu1 %v909_v0  ;;  %v228_v50 = vpack.c.bf16 %v218_v49, %v217_v48  ;;  %v303_v53 = vpack.c.bf16 %v286_v52, %v285_v51  ;;  %v589_v54 = vld [vmem:[%s1136_s2] ss:$0 sm:$0xff]  ;;  %v287_v8 = vld [vmem:[#allocation8 + $0x10] sm:$0xff]  ;;  %v289_v11 = vld [vmem:[#allocation8 + $0x20] sm:$0xff] }
  0x7a   :  { %v288_v9 = vld [vmem:[#allocation8 + $0x18] sm:$0xff]  ;;  %v290_v12 = vld [vmem:[#allocation8 + $0x28] sm:$0xff]  ;;  %v291_v14 = vld [vmem:[#allocation8 + $0x30] sm:$0xff] }
  0x7b   :  { %v304_v10 = vpack.c.bf16 %v288_v9, %v287_v8  ;;  %v305_v13 = vpack.c.bf16 %v290_v12, %v289_v11  ;;  %v293_v17 = vld [vmem:[#allocation8 + $0x40] sm:$0xff]  ;;  %v295_v20 = vld [vmem:[#allocation8 + $0x50] sm:$0xff]  ;;  %v368_v30 = vld [vmem:[#allocation10 + $0x8] sm:$0xff] }
  0x7c   :  { %636 = vmatpush3.bf16.msra.mxu0 %v142_v15  ;;  %654 = vmatpush3.bf16.msra.mxu1 %v223_v35  ;;  %v292_v15 = vld [vmem:[#allocation8 + $0x38] sm:$0xff]  ;;  %v297_v23 = vld [vmem:[#allocation8 + $0x60] sm:$0xff]  ;;  %v299_v26 = vld [vmem:[#allocation8 + $0x70] sm:$0xff] }
  0x7d   :  { %637 = vmatprep.subr.bf16.mxu0 %v909_v0  ;;  %655 = vmatprep.subr.bf16.mxu1 %v909_v0  ;;  %v306_v16 = vpack.c.bf16 %v292_v15, %v291_v14  ;;  %v590_v32 = vld [vmem:[%s1138_s4] ss:$0 sm:$0xff]  ;;  %v369_v49 = vld [vmem:[#allocation10 + $0x10] sm:$0xff]  ;;  %v371_v52 = vld [vmem:[#allocation10 + $0x20] sm:$0xff] }
  0x7e   :  { %v452_v8 = vld [vmem:[#allocation11 + $0x18] sm:$0xff]  ;;  %v449_v9 = vld [vmem:[#allocation11] sm:$0xff]  ;;  %v451_v11 = vld [vmem:[#allocation11 + $0x10] sm:$0xff] }
  0x7f   :  { %v483_v12 = vpack.c.bf16 %v451_v11, %v449_v9  ;;  %v592_v9 = vld [vmem:[%s1142_s8] ss:$0 sm:$0xff] }
  0x80   :  { %638 = vmatpush3.bf16.msra.mxu0 %v143_v18  ;;  %656 = vmatpush3.bf16.msra.mxu1 %v224_v38  ;;  %v294_v18 = vld [vmem:[#allocation8 + $0x48] sm:$0xff] }
  0x81   :  { %639 = vmatprep.subr.bf16.mxu0 %v909_v0  ;;  %657 = vmatprep.subr.bf16.mxu1 %v909_v0  ;;  %v307_v19 = vpack.c.bf16 %v294_v18, %v293_v17 }
  0x84   :  { %640 = vmatpush3.bf16.msra.mxu0 %v144_v21  ;;  %658 = vmatpush3.bf16.msra.mxu1 %v225_v41  ;;  %v296_v21 = vld [vmem:[#allocation8 + $0x58] sm:$0xff] }
  0x85   :  { %641 = vmatprep.subr.bf16.mxu0 %v909_v0  ;;  %659 = vmatprep.subr.bf16.mxu1 %v909_v0  ;;  %v308_v22 = vpack.c.bf16 %v296_v21, %v295_v20 }
  0x88   :  { %642 = vmatpush3.bf16.msra.mxu0 %v145_v24  ;;  %660 = vmatpush3.bf16.msra.mxu1 %v226_v44  ;;  %v298_v24 = vld [vmem:[#allocation8 + $0x68] sm:$0xff] }
  0x89   :  { %643 = vmatprep.subr.bf16.mxu0 %v909_v0  ;;  %661 = vmatprep.subr.bf16.mxu1 %v909_v0  ;;  %v309_v25 = vpack.c.bf16 %v298_v24, %v297_v23 }
  0x8c   :  { %644 = vmatpush3.bf16.msra.mxu0 %v146_v27  ;;  %662 = vmatpush3.bf16.msra.mxu1 %v227_v47  ;;  %v300_v27 = vld [vmem:[#allocation8 + $0x78] sm:$0xff] }
  0x8d   :  { %669 = vmatprep.subr.bf16.mxu0 %v909_v0  ;;  %663 = vmatprep.subr.bf16.mxu1 %v909_v0 }
  0x8f   :  { %646 = vmatmul.mubr.bf16.vlgmr.msra.gmra.mrb[0].mxu0 %v138_v29  ;;  %v367_v29 = vld [vmem:[#allocation10] sm:$0xff] }
  0x90   :  { %685 = vmatprep.mubr.msk.bf16.mxu0 %vm910_vm0, %v909_v0  ;;  %664 = vmatpush3.bf16.msra.mxu1 %v228_v50  ;;  %v385_v31 = vpack.c.bf16 %v368_v30, %v367_v29  ;;  %v370_v50 = vld [vmem:[#allocation10 + $0x18] sm:$0xff]  ;;  %v454_v29 = vld [vmem:[#allocation11 + $0x28] sm:$0xff] }
  0x91   :  { %689 = vmatprep.subr.bf16.mxu1 %v909_v0  ;;  %670 = vmatpush3.bf16.msra.mxu0 %v303_v53  ;;  %v386_v51 = vpack.c.bf16 %v370_v50, %v369_v49  ;;  %v372_v53 = vld [vmem:[#allocation10 + $0x28] sm:$0xff]  ;;  %v456_v30 = vld [vmem:[#allocation11 + $0x38] sm:$0xff]  ;;  %v465_v50 = vld [vmem:[#allocation11 + $0x80] sm:$0xff] }
  0x92   :  { %671 = vmatprep.subr.bf16.mxu0 %v909_v0 }
  0x95   :  { %672 = vmatpush3.bf16.msra.mxu0 %v304_v10 }
  0x96   :  { %673 = vmatprep.subr.bf16.mxu0 %v909_v0 }
  0x99   :  { %674 = vmatpush3.bf16.msra.mxu0 %v305_v13  ;;  %v591_v13 = vld [vmem:[%s1140_s6] ss:$0 sm:$0xff] }
  0x9a   :  { %675 = vmatprep.subr.bf16.mxu0 %v909_v0 }
  0x9d   :  { %676 = vmatpush3.bf16.msra.mxu0 %v306_v16 }
  0x9e   :  { %677 = vmatprep.subr.bf16.mxu0 %v909_v0 }
  0xa1   :  { %678 = vmatpush3.bf16.msra.mxu0 %v307_v19 }
  0xa2   :  { %679 = vmatprep.subr.bf16.mxu0 %v909_v0 }
  0xa5   :  { %680 = vmatpush3.bf16.msra.mxu0 %v308_v22 }
  0xa6   :  { %681 = vmatprep.subr.bf16.mxu0 %v909_v0 }
  0xa9   :  { %682 = vmatpush3.bf16.msra.mxu0 %v309_v25 }
  0xaa   :  { %683 = vmatprep.subr.bf16.mxu0 %v909_v0 }
 0x162   :  { %v187_v55 = vpop.f32.mrb[0].mxu0 }
 0x163   :  { %v188_v56 = vadd.f32 %v589_v54, %v187_v55  ;;  %v647_v57 = vpop.f32.mrb[1].mxu0  ;;  %v387_v54 = vpack.c.bf16 %v372_v53, %v371_v52  ;;  %v373_v55 = vld [vmem:[#allocation10 + $0x30] sm:$0xff]  ;;  %v470_v53 = vld [vmem:[#allocation11 + $0xa8] sm:$0xff] }
 0x164   :  { %v190_v58 = vpop.f32.mrb[2].mxu0 }
 0x165   :  { %v194_v59 = vmul.f32 %v188_v56, %v188_v56  ;;  %v648_v60 = vpop.f32.mrb[3].mxu0  ;;  %v193_v62 = vmul.f32 0.7978846, %v188_v56  ;;  %v198_v3 = vmul.f32 0.5, %v188_v56  ;;  %v374_v56 = vld [vmem:[#allocation10 + $0x38] sm:$0xff]  ;;  %v375_v58 = vld [vmem:[#allocation10 + $0x40] sm:$0xff] }
 0x166   :  { %v388_v57 = vpack.c.bf16 %v374_v56, %v373_v55  ;;  %v469_v56 = vld [vmem:[#allocation11 + $0xa0] sm:$0xff] }
 0x167   :  { %v195_v61 = vmul.f32 0.044715, %v194_v59  ;;  %v376_v59 = vld [vmem:[#allocation10 + $0x48] sm:$0xff] }
 0x168   :  { %v389_v60 = vpack.c.bf16 %v376_v59, %v375_v58  ;;  %v474_v59 = vld [vmem:[#allocation11 + $0xc8] sm:$0xff] }
 0x169   :  { %v196_v63 = vadd.f32 1.0, %v195_v61  ;;  %v377_v61 = vld [vmem:[#allocation10 + $0x50] sm:$0xff] }
 0x16b   :  { %v197_v1 = vmul.f32 %v196_v63, %v193_v62  ;;  %v378_v62 = vld [vmem:[#allocation10 + $0x58] sm:$0xff] }
 0x16c   :  { %v390_v63 = vpack.c.bf16 %v378_v62, %v377_v61  ;;  %v473_v62 = vld [vmem:[#allocation11 + $0xc0] sm:$0xff] }
 0x16d   :  { %723 = vtanh.f32 %v197_v1  ;;  %v379_v1 = vld [vmem:[#allocation10 + $0x60] sm:$0xff] }
 0x177   :  { %v724_v2 = vpop.eup %723 }
 0x178   :  { %v200_v4 = vadd.f32 1.0, %v724_v2  ;;  %v380_v2 = vld [vmem:[#allocation10 + $0x68] sm:$0xff] }
 0x17a   :  { %v201_v5 = vmul.f32 %v200_v4, %v198_v3  ;;  %v391_v3 = vpack.c.bf16 %v380_v2, %v379_v1  ;;  %v381_v4 = vld [vmem:[#allocation10 + $0x70] sm:$0xff]  ;;  %v478_v2 = vld [vmem:[#allocation11 + $0xe8] sm:$0xff] }
 0x17c   :  { %v202_v6 = vadd.f32 %v201_v5, %v1070_v28  ;;  %v310_v28 = vpack.c.bf16 %v300_v27, %v299_v26  ;;  %v382_v5 = vld [vmem:[#allocation10 + $0x78] sm:$0xff] }
 0x17e   :  { %v220_v7 = vpack.c.bf16 %v202_v6, %v202_v6  ;;  %684 = vmatpush3.bf16.msra.mxu0 %v310_v28 }
 0x180   :  { %666 = vmatmul.mubr.bf16.vlgmr.msra.gmra.mrb[0].mxu1 %v220_v7  ;;  %v450_v7 = vld [vmem:[#allocation11 + $0x8] sm:$0xff] }
 0x181   :  { %705 = vmatprep.mubr.msk.bf16.mxu1 %vm910_vm0, %v909_v0  ;;  %690 = vmatpush3.bf16.msra.mxu1 %v385_v31  ;;  %v484_v10 = vpack.c.bf16 %v452_v8, %v450_v7  ;;  %v486_v31 = vpack.c.bf16 %v456_v30, %v454_v29  ;;  %v911_v8 = vmov 0   ;;  %v481_v29 = vld [vmem:[%s1144_s10] sm:$0x3]  ;;  %s912_s10 = smov [#allocation13]  }
 0x182   :  { %691 = vmatprep.subr.bf16.mxu1 %v909_v0  ;;  %s577_s13 = sshll.u32 %s912_s10, 4  ;;  %s578_s13 = int_to_ptr.vmem [resolvable:$true] %s577_s13 }
 0x183   :  { %510 = vmatprep.subr.bf16.mxu0 %v484_v10  ;;  %s867_s19 = scalar_lea.vmem %s578_s13, 256  ;;  %p872_p7 = scmp.lt.s32.totalorder %s578_s13, %s578_s13 }
 0x184   :  { %p868_p6 = scmp.ne.s32.totalorder %s578_s13, %s867_s19  ;;  %p873_p8 = scmp.lt.s32.totalorder %s867_s19, %s867_s19 }
 0x185   :  { %692 = vmatpush3.bf16.msra.mxu1 %v386_v51  ;;  %v467_v51 = vld [vmem:[#allocation11 + $0x90] sm:$0xff] }
 0x186   :  { %693 = vmatprep.subr.bf16.mxu1 %v909_v0  ;;  %v491_v52 = vpack.c.bf16 %v467_v51, %v465_v50  ;;  %p874_p9 = por %p873_p8, %p872_p7 }
 0x188   :  { %p875_p10 = pnand %p874_p9, %p868_p6 }
 0x189   :  { %694 = vmatpush3.bf16.msra.mxu1 %v387_v54  ;;  %v472_v54 = vld [vmem:[#allocation11 + $0xb8] sm:$0xff] }
 0x18a   :  { %695 = vmatprep.subr.bf16.mxu1 %v909_v0  ;;  %v494_v55 = vpack.c.bf16 %v472_v54, %v470_v53 }
 0x18d   :  { %696 = vmatpush3.bf16.msra.mxu1 %v388_v57  ;;  %v471_v57 = vld [vmem:[#allocation11 + $0xb0] sm:$0xff] }
 0x18e   :  { %697 = vmatprep.subr.bf16.mxu1 %v909_v0  ;;  %v493_v58 = vpack.c.bf16 %v471_v57, %v469_v56 }
 0x191   :  { %698 = vmatpush3.bf16.msra.mxu1 %v389_v60  ;;  %v476_v60 = vld [vmem:[#allocation11 + $0xd8] sm:$0xff] }
 0x192   :  { %699 = vmatprep.subr.bf16.mxu1 %v909_v0  ;;  %v496_v61 = vpack.c.bf16 %v476_v60, %v474_v59 }
 0x195   :  { %700 = vmatpush3.bf16.msra.mxu1 %v390_v63  ;;  %v475_v63 = vld [vmem:[#allocation11 + $0xd0] sm:$0xff] }
 0x196   :  { %701 = vmatprep.subr.bf16.mxu1 %v909_v0  ;;  %v495_v1 = vpack.c.bf16 %v475_v63, %v473_v62 }
 0x199   :  { %702 = vmatpush3.bf16.msra.mxu1 %v391_v3  ;;  %v480_v3 = vld [vmem:[#allocation11 + $0xf8] sm:$0xff] }
 0x19a   :  { %703 = vmatprep.subr.bf16.mxu1 %v909_v0 }
 0x253   :  { %v269_v33 = vpop.f32.mrb[0].mxu1 }
 0x254   :  { %v270_v34 = vadd.f32 %v590_v32, %v269_v33  ;;  %v667_v35 = vpop.f32.mrb[1].mxu1  ;;  %v453_v32 = vld [vmem:[#allocation11 + $0x20] sm:$0xff]  ;;  %v455_v33 = vld [vmem:[#allocation11 + $0x30] sm:$0xff] }
 0x255   :  { %v272_v36 = vpop.f32.mrb[2].mxu1  ;;  %v458_v35 = vld [vmem:[#allocation11 + $0x48] sm:$0xff] }
 0x256   :  { %v276_v37 = vmul.f32 %v270_v34, %v270_v34  ;;  %v668_v38 = vpop.f32.mrb[3].mxu1  ;;  %v275_v40 = vmul.f32 0.7978846, %v270_v34  ;;  %v280_v44 = vmul.f32 0.5, %v270_v34  ;;  %v485_v34 = vpack.c.bf16 %v455_v33, %v453_v32  ;;  %v460_v36 = vld [vmem:[#allocation11 + $0x58] sm:$0xff] }
 0x257   :  { %v457_v38 = vld [vmem:[#allocation11 + $0x40] sm:$0xff] }
 0x258   :  { %v277_v39 = vmul.f32 0.044715, %v276_v37  ;;  %v488_v37 = vpack.c.bf16 %v460_v36, %v458_v35 }
 0x25a   :  { %v278_v41 = vadd.f32 1.0, %v277_v39  ;;  %v459_v39 = vld [vmem:[#allocation11 + $0x50] sm:$0xff] }
 0x25c   :  { %v279_v42 = vmul.f32 %v278_v41, %v275_v40  ;;  %v487_v40 = vpack.c.bf16 %v459_v39, %v457_v38  ;;  %v462_v41 = vld [vmem:[#allocation11 + $0x68] sm:$0xff] }
 0x25e   :  { %725 = vtanh.f32 %v279_v42  ;;  %v464_v42 = vld [vmem:[#allocation11 + $0x78] sm:$0xff] }
 0x268   :  { %v726_v43 = vpop.eup %725 }
 0x269   :  { %v282_v45 = vadd.f32 1.0, %v726_v43  ;;  %v490_v43 = vpack.c.bf16 %v464_v42, %v462_v41 }
 0x26b   :  { %v283_v46 = vmul.f32 %v282_v45, %v280_v44  ;;  %v461_v44 = vld [vmem:[#allocation11 + $0x60] sm:$0xff]  ;;  %v463_v45 = vld [vmem:[#allocation11 + $0x70] sm:$0xff] }
 0x26d   :  { %v284_v47 = vadd.f32 %v283_v46, %v202_v6  ;;  %v392_v6 = vpack.c.bf16 %v382_v5, %v381_v4  ;;  %v489_v46 = vpack.c.bf16 %v463_v45, %v461_v44  ;;  %v498_v4 = vpack.c.bf16 %v480_v3, %v478_v2  ;;  %v477_v5 = vld [vmem:[#allocation11 + $0xe0] sm:$0xff] }
 0x26f   :  { %v302_v48 = vpack.c.bf16 %v284_v47, %v284_v47  ;;  %704 = vmatpush3.bf16.msra.mxu1 %v392_v6  ;;  %v479_v6 = vld [vmem:[#allocation11 + $0xf0] sm:$0xff] }
 0x270   :  { %v497_v7 = vpack.c.bf16 %v479_v6, %v477_v5 }
 0x271   :  { %686 = vmatmul.mubr.bf16.vlgmr.msra.gmra.mrb[4].mxu0 %v302_v48  ;;  %v468_v48 = vld [vmem:[#allocation11 + $0x98] sm:$0xff] }
 0x272   :  { %511 = vmatpush1.bf16.msra.mxu0 %v483_v12  ;;  %542 = vmatprep.mubr.bf16.mxu0 %v911_v8 }
 0x273   :  { %512 = vmatprep.subr.bf16.mxu0 %v486_v31 }
 0x276   :  { %513 = vmatpush1.bf16.msra.mxu0 %v485_v34 }
 0x277   :  { %514 = vmatprep.subr.bf16.mxu0 %v488_v37 }
 0x27a   :  { %515 = vmatpush1.bf16.msra.mxu0 %v487_v40 }
 0x27b   :  { %516 = vmatprep.subr.bf16.mxu0 %v490_v43 }
 0x27e   :  { %517 = vmatpush1.bf16.msra.mxu0 %v489_v46 }
 0x344   :  { %v351_v14 = vpop.f32.mrb[4].mxu0 }
 0x345   :  { %v352_v15 = vadd.f32 %v591_v13, %v351_v14  ;;  %v687_v16 = vpop.f32.mrb[5].mxu0 }
 0x346   :  { %v354_v0 = vpop.f32.mrb[6].mxu0 }
 0x347   :  { %v358_v17 = vmul.f32 %v352_v15, %v352_v15  ;;  %v688_v18 = vpop.f32.mrb[7].mxu0  ;;  %v357_v20 = vmul.f32 0.7978846, %v352_v15  ;;  %v362_v24 = vmul.f32 0.5, %v352_v15 }
 0x349   :  { %v359_v19 = vmul.f32 0.044715, %v358_v17 }
 0x34b   :  { %v360_v21 = vadd.f32 1.0, %v359_v19 }
 0x34d   :  { %v361_v22 = vmul.f32 %v360_v21, %v357_v20 }
 0x34f   :  { %727 = vtanh.f32 %v361_v22 }
 0x359   :  { %v728_v23 = vpop.eup %727 }
 0x35a   :  { %v364_v25 = vadd.f32 1.0, %v728_v23 }
 0x35c   :  { %v365_v26 = vmul.f32 %v364_v25, %v362_v24  ;;  %v500_v25 = vlaneseq }
 0x35e   :  { %v1111_v27 = vadd.f32 %v365_v26, %v284_v47  ;;  %v466_v47 = vld [vmem:[#allocation11 + $0x88] sm:$0xff]  ;;  %v501_v26 = vshrl.u32 %v500_v25, 7 }
 0x35f   :  { %v492_v49 = vpack.c.bf16 %v468_v48, %v466_v47 }
 0x360   :  { %v384_v28 = vpack.c.bf16 %v1111_v27, %v1111_v27  ;;  %v506_v30 = vsub.s32 1, %v501_v26 }
 0x361   :  { %518 = vmatprep.subr.bf16.mxu0 %v492_v49 }
 0x362   :  { %706 = vmatmul.mubr.bf16.vlgmr.msra.gmra.mrb[4].mxu1 %v384_v28  ;;  %519 = vmatpush1.bf16.msra.mxu0 %v491_v52  ;;  %v502_v28 = vsub.s32 0, %v501_v26  ;;  %v507_v32 = vrot.slane %v481_v29, %v506_v30 }
 0x363   :  { %520 = vmatprep.subr.bf16.mxu0 %v494_v55 }
 0x364   :  { %v503_v31 = vrot.slane %v481_v29, %v502_v28 }
 0x366   :  { %521 = vmatpush1.bf16.msra.mxu0 %v493_v58 }
 0x367   :  { %522 = vmatprep.subr.bf16.mxu0 %v496_v61 }
 0x36a   :  { %523 = vmatpush1.bf16.msra.mxu0 %v495_v1 }
 0x36b   :  { %524 = vmatprep.subr.bf16.mxu0 %v498_v4 }
 0x36e   :  { %525 = vmatpush1.bf16.msra.mxu0 %v497_v7 }
 0x435   :  { %v433_v10 = vpop.f32.mrb[4].mxu1 }
 0x436   :  { %v434_v11 = vadd.f32 %v592_v9, %v433_v10  ;;  %v707_v12 = vpop.f32.mrb[5].mxu1 }
 0x437   :  { %v436_v13 = vpop.f32.mrb[6].mxu1 }
 0x438   :  { %v440_v14 = vmul.f32 %v434_v11, %v434_v11  ;;  %v708_v15 = vpop.f32.mrb[7].mxu1  ;;  %v439_v0 = vmul.f32 0.7978846, %v434_v11  ;;  %v444_v20 = vmul.f32 0.5, %v434_v11 }
 0x43a   :  { %v441_v16 = vmul.f32 0.044715, %v440_v14 }
 0x43c   :  { %v442_v17 = vadd.f32 1.0, %v441_v16 }
 0x43e   :  { %v443_v18 = vmul.f32 %v442_v17, %v439_v0 }
 0x440   :  { %729 = vtanh.f32 %v443_v18 }
 0x44a   :  { %v730_v19 = vpop.eup %729 }
 0x44b   :  { %v446_v21 = vadd.f32 1.0, %v730_v19 }
 0x44d   :  { %v447_v22 = vmul.f32 %v446_v21, %v444_v20 }
 0x44f   :  { %v448_v23 = vadd.f32 %v447_v22, %v1111_v27 }
 0x451   :  { %v482_v24 = vpack.c.bf16 %v448_v23, %v448_v23 }
 0x453   :  { %543 = vmatmul.mubr.bf16.vlgmr.msra.gmra.mrb[8].mxu0 %v482_v24 }
 0x526   :  { %v544_v33 = vpop.f32.mrb[8].mxu0 }
 0x527   :  { %v545_v34 = vadd.f32 %v544_v33, %v503_v31  ;;  %v546_v35 = vpop.f32.mrb[9].mxu0 }
 0x528   :  { %v547_v36 = vadd.f32 %v546_v35, %v507_v32  ;;  %v548_v37 = vpop.f32.mrb[10].mxu0 }
 0x529   :  { %v553_v38 = vmul.f32 %v545_v34, %v545_v34  ;;  %v549_v39 = vpop.f32.mrb[11].mxu0  ;;  %v551_v42 = vmul.f32 0.7978846, %v545_v34  ;;  %v561_v50 = vmul.f32 0.5, %v545_v34 }
 0x52a   :  { %v554_v27 = vmul.f32 %v547_v36, %v547_v36  ;;  %v552_v44 = vmul.f32 0.7978846, %v547_v36  ;;  %v562_v52 = vmul.f32 0.5, %v547_v36 }
 0x52b   :  { %v555_v40 = vmul.f32 0.044715, %v553_v38 }
 0x52c   :  { %v556_v41 = vmul.f32 0.044715, %v554_v27 }
 0x52d   :  { %v557_v43 = vadd.f32 1.0, %v555_v40 }
 0x52e   :  { %v558_v45 = vadd.f32 1.0, %v556_v41 }
 0x52f   :  { %v559_v46 = vmul.f32 %v557_v43, %v551_v42 }
 0x530   :  { %v560_v47 = vmul.f32 %v558_v45, %v552_v44 }
 0x531   :  { %731 = vtanh.f32 %v559_v46 }
 0x532   :  { %733 = vtanh.f32 %v560_v47 }
 0x53b   :  { %v732_v48 = vpop.eup %731 }
 0x53c   :  { %v734_v49 = vpop.eup %733  ;;  %v565_v51 = vadd.f32 1.0, %v732_v48 }
 0x53d   :  { %v566_v53 = vadd.f32 1.0, %v734_v49 }
 0x53e   :  { %v567_v54 = vmul.f32 %v565_v51, %v561_v50 }
 0x53f   :  { %v568_v55 = vmul.f32 %v566_v53, %v562_v52 }
 0x540   :  { %569 = vst [vmem:[#allocation13] sm:$0xff] %v567_v54 }
 0x541   :  { %570 = vst [vmem:[#allocation13 + $0x8] sm:$0xff] %v568_v55 }
 0x542   :  { %878 = shalt.err (!%p875_p10)
}
 0x543   :  { %s879_s20 = scalar_lea.hbm %s1145_s11, 256 }
 0x544   :  { %p880_p11 = scmp.ne.s32.totalorder %s1145_s11, %s879_s20  ;;  %p883_p12 = scmp.lt.u32.totalorder %s879_s20, %s1145_s11 }
 0x546   :  { %p885_p13 = pnand %p883_p12, %p880_p11 }
 0x548   :  { %888 = shalt.err (!%p885_p13)
}
 0x549   :  { %580 = dma.vmem_to_hbm [thread:$0]  %s578_s13, 256, %s1145_s11, [#allocation4]  }
 0x54a   :  { %897 = dma.done.wait [#allocation4], 256  }
 0x54b   :  { %898 = vsyncadd [#allocation4], 4294967040 }
 0x54c   :  { %584 = vsyncpa [#allocation3], 1 }
 0x54d   :  { %585 = vsyncpa [#allocation6], 1 }
 0x54e   :  { %586 = vsyncpa [#allocation9], 1 }
 0x54f   :  { %587 = vsyncpa [#allocation12], 1 }
 0x550   :  { %588 = vsyncpa [#allocation4], 1 }

</bundles_post_ra>
